<compile_context>
chip_gen: v7x
topology: tpu7x:2x2x1
jax: 0.10.0
libtpu: 0.0.40
codegen_flags: <defaults>
</compile_context>

<pallas_src>
import functools

import jax
import jax.numpy as jnp
from jax.experimental import pallas as pl
from jax.experimental.pallas import tpu as pltpu

# Row (sublane) tiles must be multiples of 8 (or the full extent); lane tiles multiples of 128.
_ROW_TILES = (256, 128, 64, 32, 16, 8)
_LANE_TILES_N = (256, 128)        # output/lane dim: 256 fills v6e/v7x MXU, cheap on v5e
_LANE_TILES_K = (512, 256, 128)   # contraction dim: larger tiles amortize per-step overhead


@functools.lru_cache(maxsize=None)
def _vmem_limit_bytes():
    """Generation-aware VMEM limit: ~75% of physical (v7x 64 MiB, v5e/v6e 128 MiB)."""
    cap = 64 * 1024 * 1024
    try:
        info = pltpu.get_tpu_info()
        cap = int(getattr(info, "vmem_capacity_bytes", cap)) or cap
    except Exception:
        pass
    return min((cap * 3) // 4, 100 * 1024 * 1024)


def _cparams(dims):
    return pltpu.CompilerParams(dimension_semantics=dims,
                                vmem_limit_bytes=_vmem_limit_bytes())


def _pick_tile(dim, candidates):
    for c in candidates:
        if dim >= c and dim % c == 0:
            return c
    return dim  # full extent is always a legal block shape


def _pick_row_tile(m):
    # Prefer tiles that leave >=2 row blocks so the leading "parallel" axis feeds both v7x cores.
    for c in _ROW_TILES:
        if m % c == 0 and m // c >= 2:
            return c
    for c in _ROW_TILES:
        if m % c == 0:
            return c
    return m


# ----------------------------------------------------------------------------
# 1) Fused Q/K/V projection: single concatenated (D, 3D) weight, one dot per block.
# ----------------------------------------------------------------------------
def _qkv_kernel(x_ref, w_ref, b_ref, qkv_ref, acc_ref):
    kk = pl.program_id(2)

    @pl.when(kk == 0)
    def _():
        acc_ref[...] = jnp.zeros_like(acc_ref)

    acc_ref[...] += jnp.dot(x_ref[...], w_ref[...],
                            preferred_element_type=jnp.float32)

    @pl.when(kk == pl.num_programs(2) - 1)
    def _():
        qkv_ref[...] = (acc_ref[...] + b_ref[...]).astype(qkv_ref.dtype)


def pallas_qkv(x2d, wqkv, bqkv):
    """x2d: (M, D) bf16; wqkv: (D, 3D) bf16; bqkv: (3D,) f32 -> (M, 3D) bf16."""
    m, d = x2d.shape
    n3 = wqkv.shape[1]
    tm = _pick_row_tile(m)
    tn = _pick_tile(n3, _LANE_TILES_N)
    tk = _pick_tile(d, _LANE_TILES_K)
    grid = (m // tm, n3 // tn, d // tk)

    return pl.pallas_call(
        _qkv_kernel,
        out_shape=jax.ShapeDtypeStruct((m, n3), jnp.bfloat16),
        grid=grid,
        in_specs=[
            pl.BlockSpec((tm, tk), lambda i, j, k: (i, k)),
            pl.BlockSpec((tk, tn), lambda i, j, k: (k, j)),
            pl.BlockSpec((1, tn), lambda i, j, k: (0, j)),
        ],
        out_specs=pl.BlockSpec((tm, tn), lambda i, j, k: (i, j)),
        scratch_shapes=[pltpu.VMEM((tm, tn), jnp.float32)],
        compiler_params=_cparams(("parallel", "parallel", "arbitrary")),
    )(x2d, wqkv, bqkv.reshape(1, n3))


# ----------------------------------------------------------------------------
# 2) Scaled dot-product attention: packed groups + query-row tiling.
# ----------------------------------------------------------------------------
def _attn_kernel(q_ref, k_ref, v_ref, ctx_ref, attn_ref, *, scale):
    # q: (ht, tq, dph), k/v: (ht, S, dph) — all bf16.
    q = q_ref[...] * scale                       # pre-scale q (tq*dph muls, not tq*S)
    s = jnp.einsum("hqd,hkd->hqk", q, k_ref[...],
                   preferred_element_type=jnp.float32)
    m = jnp.max(s, axis=-1, keepdims=True)
    e = jnp.exp(s - m)
    denom = jnp.sum(e, axis=-1, keepdims=True)
    p = e * pl.reciprocal(denom, approx=True)    # EUP slot; frees VALU/issue bandwidth
    attn_ref[...] = p.astype(attn_ref.dtype)
    ctx = jnp.einsum("hqk,hkd->hqd", p.astype(v_ref.dtype), v_ref[...],
                     preferred_element_type=jnp.float32)
    ctx_ref[...] = ctx.astype(ctx_ref.dtype)


def _choose_head_pack(g, s, dph, tq, budget):
    """Largest group count per step fitting the VMEM budget, keeping >=2 grid steps."""
    in_b, ctx_b, probs_b, f32 = 2, 2, 4, 4   # bf16 in/ctx, f32 probs/temps
    best = 1
    for ht in range(1, g + 1):
        if g % ht:
            continue
        if g >= 2 and g // ht < 2:
            continue  # keep >=2 parallel steps so both v7x TensorCores get work
        pipelined = 2 * (ht * tq * dph * in_b           # q block (double-buffered)
                         + 2 * ht * s * dph * in_b      # k, v blocks
                         + ht * tq * dph * ctx_b        # context output block
                         + ht * tq * s * probs_b)       # probs output block
        live = 3 * ht * tq * s * f32                    # scores / exp / probs f32 temps
        if pipelined + live <= budget:
            best = max(best, ht)
    return best


def pallas_attention(q, k, v, scale):
    """q,k,v: (G, S, dph) bf16, G = batch*heads. Returns (context bf16, attention f32)."""
    g, s, dph = q.shape
    tq = _pick_tile(s, _ROW_TILES)
    budget = int(_vmem_limit_bytes() * 0.4)
    ht = _choose_head_pack(g, s, dph, tq, budget)

    q_spec = pl.BlockSpec((ht, tq, dph), lambda i, qi: (i, qi, 0))
    kv_spec = pl.BlockSpec((ht, s, dph), lambda i, qi: (i, 0, 0))
    return pl.pallas_call(
        functools.partial(_attn_kernel, scale=scale),
        out_shape=(
            jax.ShapeDtypeStruct((g, s, dph), jnp.bfloat16),   # context
            jax.ShapeDtypeStruct((g, s, s), jnp.float32),      # attention probs (module output)
        ),
        grid=(g // ht, s // tq),
        in_specs=[q_spec, kv_spec, kv_spec],
        out_specs=(
            pl.BlockSpec((ht, tq, dph), lambda i, qi: (i, qi, 0)),
            pl.BlockSpec((ht, tq, s), lambda i, qi: (i, qi, 0)),
        ),
        compiler_params=_cparams(("parallel", "parallel")),
    )(q, k, v)


# ----------------------------------------------------------------------------
# 3) Fused: y = LayerNorm(res + x @ w + b)   (K-axis reduction grid, f32 LN epilogue)
# ----------------------------------------------------------------------------
def _matmul_res_ln_kernel(x_ref, w_ref, b_ref, res_ref, g_ref, be_ref,
                          o_ref, acc_ref, *, eps):
    kk = pl.program_id(1)

    @pl.when(kk == 0)
    def _():
        acc_ref[...] = jnp.zeros_like(acc_ref)

    acc_ref[...] += jnp.dot(x_ref[...], w_ref[...],
                            preferred_element_type=jnp.float32)

    @pl.when(kk == pl.num_programs(1) - 1)
    def _():
        z = acc_ref[...] + b_ref[...] + res_ref[...].astype(jnp.float32)
        mu = jnp.mean(z, axis=-1, keepdims=True)
        var = jnp.mean((z - mu) ** 2, axis=-1, keepdims=True)
        zhat = (z - mu) * jax.lax.rsqrt(var + eps)
        o_ref[...] = (zhat * g_ref[...] + be_ref[...]).astype(o_ref.dtype)


def pallas_matmul_residual_ln(x2d, w, b, res2d, gamma, beta, out_dtype, eps=1e-5):
    m, kdim = x2d.shape
    dout = w.shape[1]
    tm = _pick_row_tile(m)
    tk = _pick_tile(kdim, _LANE_TILES_K)
    grid = (m // tm, kdim // tk)

    return pl.pallas_call(
        functools.partial(_matmul_res_ln_kernel, eps=eps),
        out_shape=jax.ShapeDtypeStruct((m, dout), out_dtype),
        grid=grid,
        in_specs=[
            pl.BlockSpec((tm, tk), lambda i, k: (i, k)),      # x (bf16)
            pl.BlockSpec((tk, dout), lambda i, k: (k, 0)),    # w (bf16)
            pl.BlockSpec((1, dout), lambda i, k: (0, 0)),     # b (f32)
            pl.BlockSpec((tm, dout), lambda i, k: (i, 0)),    # residual (f32)
            pl.BlockSpec((1, dout), lambda i, k: (0, 0)),     # gamma
            pl.BlockSpec((1, dout), lambda i, k: (0, 0)),     # beta
        ],
        out_specs=pl.BlockSpec((tm, dout), lambda i, k: (i, 0)),
        scratch_shapes=[pltpu.VMEM((tm, dout), jnp.float32)],
        compiler_params=_cparams(("parallel", "arbitrary")),
    )(x2d, w, b.reshape(1, dout), res2d, gamma.reshape(1, dout), beta.reshape(1, dout))


# ----------------------------------------------------------------------------
# 4) Fused FeedForward: y = LayerNorm(x + relu(x@w1+b1)@w2 + b2); hmid stays in VMEM.
# ----------------------------------------------------------------------------
def _ffn_res_ln_kernel(x_ref, w1_ref, b1_ref, w2_ref, b2_ref, g_ref, be_ref,
                       o_ref, acc_ref, *, eps):
    ff = pl.program_id(1)

    @pl.when(ff == 0)
    def _():
        acc_ref[...] = jnp.zeros_like(acc_ref)

    h = jnp.dot(x_ref[...], w1_ref[...],
                preferred_element_type=jnp.float32) + b1_ref[...]
    h = jnp.maximum(h, 0.0)
    acc_ref[...] += jnp.dot(h.astype(jnp.bfloat16), w2_ref[...],
                            preferred_element_type=jnp.float32)

    @pl.when(ff == pl.num_programs(1) - 1)
    def _():
        z = acc_ref[...] + b2_ref[...] + x_ref[...].astype(jnp.float32)  # x is also residual
        mu = jnp.mean(z, axis=-1, keepdims=True)
        var = jnp.mean((z - mu) ** 2, axis=-1, keepdims=True)
        zhat = (z - mu) * jax.lax.rsqrt(var + eps)
        o_ref[...] = (zhat * g_ref[...] + be_ref[...]).astype(o_ref.dtype)


def pallas_ffn_residual_ln(x2d, w1, b1, w2, b2, gamma, beta, out_dtype, eps=1e-5):
    m, d = x2d.shape
    f = w1.shape[1]
    tm = _pick_row_tile(m)
    tf = _pick_tile(f, _LANE_TILES_N)
    grid = (m // tm, f // tf)

    return pl.pallas_call(
        functools.partial(_ffn_res_ln_kernel, eps=eps),
        out_shape=jax.ShapeDtypeStruct((m, d), out_dtype),
        grid=grid,
        in_specs=[
            pl.BlockSpec((tm, d), lambda i, j: (i, 0)),       # x (bf16; also residual)
            pl.BlockSpec((d, tf), lambda i, j: (0, j)),       # w1 (bf16)
            pl.BlockSpec((1, tf), lambda i, j: (0, j)),       # b1 (f32)
            pl.BlockSpec((tf, d), lambda i, j: (j, 0)),       # w2 (bf16)
            pl.BlockSpec((1, d), lambda i, j: (0, 0)),        # b2 (f32)
            pl.BlockSpec((1, d), lambda i, j: (0, 0)),        # gamma
            pl.BlockSpec((1, d), lambda i, j: (0, 0)),        # beta
        ],
        out_specs=pl.BlockSpec((tm, d), lambda i, j: (i, 0)),
        scratch_shapes=[pltpu.VMEM((tm, d), jnp.float32)],
        compiler_params=_cparams(("parallel", "arbitrary")),
    )(x2d, w1, b1.reshape(1, f), w2, b2.reshape(1, d), gamma.reshape(1, d), beta.reshape(1, d))


# ----------------------------------------------------------------------------
# Parameter prep (one-time host-side concat + bf16 casts for MXU/DMA efficiency)
# ----------------------------------------------------------------------------
def prepare_encoder_params(params):
    p = dict(params)
    p["wqkv"] = jnp.concatenate(
        [params["wq"], params["wk"], params["wv"]], axis=1).astype(jnp.bfloat16)
    p["bqkv"] = jnp.concatenate([params["bq"], params["bk"], params["bv"]])
    p["wo_bf16"] = params["wo"].astype(jnp.bfloat16)
    p["w1_bf16"] = params["w1"].astype(jnp.bfloat16)
    p["w2_bf16"] = params["w2"].astype(jnp.bfloat16)
    return p


# ----------------------------------------------------------------------------
# EncoderLayer forward (Pallas)
# ----------------------------------------------------------------------------
def encoder_layer_pallas(prepared, inputs):
    b, s, d = inputs.shape
    h = prepared["num_heads"]
    dph = d // h

    x2 = inputs.reshape(b * s, d)                    # f32 residual for first LayerNorm
    x2_bf16 = x2.astype(jnp.bfloat16)

    # fused Q/K/V projections (nn.Linear): y = x @ [Wq|Wk|Wv] + [bq|bk|bv]
    qkv = pallas_qkv(x2_bf16, prepared["wqkv"], prepared["bqkv"])      # (M, 3D) bf16
    query = qkv[:, :d].reshape(b * h, s, dph)
    key = qkv[:, d:2 * d].reshape(b * h, s, dph)
    value = qkv[:, 2 * d:].reshape(b * h, s, dph)
    # (row-major reshape is identical to torch .view(batch*heads, -1, dim_per_head))

    scale = float((dph * h) ** (-0.5))               # matches (key.size(-1)*num_heads)**-0.5
    context, attention = pallas_attention(query, key, value, scale)

    context2 = context.reshape(b * s, d)             # torch .view(batch, -1, dph*heads)

    # fused: output projection + residual add + LayerNorm  (attn_out stays bf16 in HBM)
    attn_out = pallas_matmul_residual_ln(
        context2, prepared["wo_bf16"], prepared["bo"], x2,
        prepared["ln_a_g"], prepared["ln_a_b"], out_dtype=jnp.bfloat16)

    # fused FeedForward (Conv1d k=1 == linear over model_dim) + residual + LayerNorm
    output = pallas_ffn_residual_ln(
        attn_out, prepared["w1_bf16"], prepared["b1"],
        prepared["w2_bf16"], prepared["b2"],
        prepared["ln_f_g"], prepared["ln_f_b"], out_dtype=jnp.float32)

    return output.reshape(b, s, d), attention


# ----------------------------------------------------------------------------
# Pure-JAX f32 reference (same math, no Pallas) for a correctness check
# ----------------------------------------------------------------------------
def encoder_layer_ref(params, inputs):
    b, s, d = inputs.shape
    h = params["num_heads"]
    dph = d // h
    x2 = inputs.reshape(b * s, d)
    key = (x2 @ params["wk"] + params["bk"]).reshape(b * h, s, dph)
    value = (x2 @ params["wv"] + params["bv"]).reshape(b * h, s, dph)
    query = (x2 @ params["wq"] + params["bq"]).reshape(b * h, s, dph)
    scale = (dph * h) ** (-0.5)
    scores = jnp.einsum("gqd,gkd->gqk", query, key) * scale
    attn = jax.nn.softmax(scores, axis=-1)
    ctx = jnp.einsum("gqk,gkd->gqd", attn, value).reshape(b, s, d)
    proj = (ctx.reshape(b * s, d) @ params["wo"] + params["bo"]).reshape(b, s, d)

    def ln(z, g, be):
        mu = jnp.mean(z, -1, keepdims=True)
        var = jnp.mean((z - mu) ** 2, -1, keepdims=True)
        return (z - mu) / jnp.sqrt(var + 1e-5) * g + be

    attn_out = ln(inputs + proj, params["ln_a_g"], params["ln_a_b"])
    hmid = jnp.maximum(attn_out.reshape(b * s, d) @ params["w1"] + params["b1"], 0.0)
    ffn = (hmid @ params["w2"] + params["b2"]).reshape(b, s, d)
    return ln(attn_out + ffn, params["ln_f_g"], params["ln_f_b"]), attn


# ----------------------------------------------------------------------------
def make_params(key, model_dim, num_heads, ffn_dim):
    ks = jax.random.split(key, 12)

    def w(k, din, dout):
        return (0.05 * jax.random.normal(k, (din, dout))).astype(jnp.float32)

    def bvec(k, n):
        return (0.05 * jax.random.normal(k, (n,))).astype(jnp.float32)

    return {
        "num_heads": num_heads,
        "wk": w(ks[0], model_dim, model_dim), "bk": bvec(ks[1], model_dim),
        "wv": w(ks[2], model_dim, model_dim), "bv": bvec(ks[3], model_dim),
        "wq": w(ks[4], model_dim, model_dim), "bq": bvec(ks[5], model_dim),
        "wo": w(ks[6], model_dim, model_dim), "bo": bvec(ks[7], model_dim),
        "w1": w(ks[8], model_dim, ffn_dim), "b1": bvec(ks[9], ffn_dim),
        "w2": w(ks[10], ffn_dim, model_dim), "b2": bvec(ks[11], model_dim),
        # LayerNorm params: PyTorch default init (ones / zeros)
        "ln_a_g": jnp.ones((model_dim,), jnp.float32),
        "ln_a_b": jnp.zeros((model_dim,), jnp.float32),
        "ln_f_g": jnp.ones((model_dim,), jnp.float32),
        "ln_f_b": jnp.zeros((model_dim,), jnp.float32),
    }


if __name__ == "__main__":
    B, S, D, H, F = 2, 8, 32, 4, 64
    root = jax.random.PRNGKey(0)
    pkey, xkey = jax.random.split(root)
    params = make_params(pkey, D, H, F)
    prepared = prepare_encoder_params(params)
    x = jax.random.normal(xkey, (B, S, D), dtype=jnp.float32)

    out, attn = encoder_layer_pallas(prepared, x)
    out = jax.block_until_ready(out)
    attn = jax.block_until_ready(attn)

    ref_out, ref_attn = encoder_layer_ref(params, x)
    assert out.shape == (B, S, D) and attn.shape == (B * H, S, S)
    # tolerances account for bf16 matmul operands / bf16 intermediates and the EUP approx
    # reciprocal in the softmax normalization (f32 reference)
    assert jnp.allclose(out, ref_out, atol=5e-2, rtol=5e-2)
    assert jnp.allclose(attn, ref_attn, atol=3e-2, rtol=3e-2)

    print("KERNEL_OK")
</pallas_src>

<mosaic_0001>
module attributes {stable_mosaic.version = 11 : i64} {
  func.func @_qkv_kernel(%arg0: i32, %arg1: i32, %arg2: i32, %arg3: memref<8x32xbf16, #tpu.memory_space<vmem>>, %arg4: memref<32x96xbf16, #tpu.memory_space<vmem>>, %arg5: memref<1x96xf32, #tpu.memory_space<vmem>>, %arg6: memref<8x96xbf16, #tpu.memory_space<vmem>>, %arg7: memref<8x96xf32, #tpu.memory_space<vmem>>) attributes {dimension_semantics = [#tpu.dimension_semantics<parallel>, #tpu.dimension_semantics<parallel>, #tpu.dimension_semantics<arbitrary>], iteration_bounds = array<i64: 2, 1, 1>, scalar_prefetch = 0 : i64, scratch_operands = 1 : i64, tpu.core_type = #tpu.core_type<tc>, window_params = [{transform_indices = @transform_0, window_bounds = array<i64: 8, 32>}, {transform_indices = @transform_1, window_bounds = array<i64: 32, 96>}, {transform_indices = @transform_2, window_bounds = array<i64: 1, 96>}, {transform_indices = @transform_3, window_bounds = array<i64: 8, 96>}]} {
    %c0_i32 = arith.constant 0 : i32
    %0 = arith.cmpi eq, %arg2, %c0_i32 : i32
    %1 = arith.extui %0 : i1 to i32
    %c0_i32_0 = arith.constant 0 : i32
    %2 = arith.cmpi ne, %1, %c0_i32_0 : i32
    scf.if %2 {
      %cst_10 = arith.constant 0.000000e+00 : f32
      %12 = vector.broadcast %cst_10 : f32 to vector<8x96xf32>
      %c0_11 = arith.constant 0 : index
      %c0_12 = arith.constant 0 : index
      %13 = vector.load %arg7[%c0_11, %c0_12] : memref<8x96xf32, #tpu.memory_space<vmem>>, vector<8x96xf32>
      tpu.vector_store %arg7[%c0_11, %c0_12], %12 {strides = array<i32>} : memref<8x96xf32, #tpu.memory_space<vmem>>, vector<8x96xf32>,
    } else {
    }
    %c0 = arith.constant 0 : index
    %c0_1 = arith.constant 0 : index
    %3 = vector.load %arg7[%c0, %c0_1] : memref<8x96xf32, #tpu.memory_space<vmem>>, vector<8x96xf32>
    %c0_2 = arith.constant 0 : index
    %c0_3 = arith.constant 0 : index
    %4 = vector.load %arg3[%c0_2, %c0_3] : memref<8x32xbf16, #tpu.memory_space<vmem>>, vector<8x32xbf16>
    %c0_4 = arith.constant 0 : index
    %c0_5 = arith.constant 0 : index
    %5 = vector.load %arg4[%c0_4, %c0_5] : memref<32x96xbf16, #tpu.memory_space<vmem>>, vector<32x96xbf16>
    %cst = arith.constant dense<0.000000e+00> : vector<8x96xf32>
    %6 = tpu.matmul %4, %5, %cst {dimension_numbers = #tpu.dot_dimension_numbers<[1], [0], [0], [1], [0, 0, 1, 1], [], []>} : vector<8x32xbf16>, vector<32x96xbf16>, vector<8x96xf32> -> vector<8x96xf32>
    %7 = arith.addf %3, %6 : vector<8x96xf32>
    %c0_6 = arith.constant 0 : index
    %c0_7 = arith.constant 0 : index
    %8 = vector.load %arg7[%c0_6, %c0_7] : memref<8x96xf32, #tpu.memory_space<vmem>>, vector<8x96xf32>
    tpu.vector_store %arg7[%c0_6, %c0_7], %7 {strides = array<i32>} : memref<8x96xf32, #tpu.memory_space<vmem>>, vector<8x96xf32>,
    %c0_i32_8 = arith.constant 0 : i32
    %9 = arith.cmpi eq, %arg2, %c0_i32_8 : i32
    %10 = arith.extui %9 : i1 to i32
    %c0_i32_9 = arith.constant 0 : i32
    %11 = arith.cmpi ne, %10, %c0_i32_9 : i32
    scf.if %11 {
      %c0_10 = arith.constant 0 : index
      %c0_11 = arith.constant 0 : index
      %12 = vector.load %arg7[%c0_10, %c0_11] : memref<8x96xf32, #tpu.memory_space<vmem>>, vector<8x96xf32>
      %c0_12 = arith.constant 0 : index
      %c0_13 = arith.constant 0 : index
      %13 = vector.load %arg5[%c0_12, %c0_13] : memref<1x96xf32, #tpu.memory_space<vmem>>, vector<1x96xf32>
      %14 = vector.broadcast %13 : vector<1x96xf32> to vector<8x96xf32>
      %15 = arith.addf %12, %14 : vector<8x96xf32>
      %16 = arith.truncf %15 : vector<8x96xf32> to vector<8x96xbf16>
      %c0_14 = arith.constant 0 : index
      %c0_15 = arith.constant 0 : index
      %17 = vector.load %arg6[%c0_14, %c0_15] : memref<8x96xbf16, #tpu.memory_space<vmem>>, vector<8x96xbf16>
      tpu.vector_store %arg6[%c0_14, %c0_15], %16 {strides = array<i32>} : memref<8x96xbf16, #tpu.memory_space<vmem>>, vector<8x96xbf16>,
    } else {
    }
    return
  }
  func.func @transform_0(%arg0: i32, %arg1: i32, %arg2: i32) -> (i32, i32) {
    %c0_i32 = arith.constant 0 : i32
    return %arg0, %arg2 : i32, i32
  }
  func.func @transform_1(%arg0: i32, %arg1: i32, %arg2: i32) -> (i32, i32) {
    %c0_i32 = arith.constant 0 : i32
    return %arg2, %arg1 : i32, i32
  }
  func.func @transform_2(%arg0: i32, %arg1: i32, %arg2: i32) -> (i32, i32) {
    %c0_i32 = arith.constant 0 : i32
    %c0_i32_0 = arith.constant 0 : i32
    return %c0_i32, %arg1 : i32, i32
  }
  func.func @transform_3(%arg0: i32, %arg1: i32, %arg2: i32) -> (i32, i32) {
    %c0_i32 = arith.constant 0 : i32
    return %arg0, %arg1 : i32, i32
  }
}

</mosaic_0001>

<bundles_post_ra>
// kernel: tpu_custom_call.1
= control target key start
LH: loop header
LB: loop body
LE: loop exit
PB: predicated region body
PF: predicated region fallthrough
CT: control target
= control target key end

     0   :  { %8 = vsyncpa [#allocation4], 0  ;;  %s968_s0 = inlined_call_operand.hbm [shape: bf16[16,32], index: 0, kind: input, shape index: {}]   ;;  %s969_s1 = inlined_call_operand.hbm [shape: bf16[32,96], index: 1, kind: input, shape index: {}]   ;;  %s970_s2 = inlined_call_operand.vmem [shape: f32[1,96], index: 2, kind: input, shape index: {}]   ;;  %s971_s3 = inlined_call_operand.hbm [shape: bf16[16,96], index: 3, kind: output, shape index: {}]  }
   0x1   :  { %10 = vsyncpa [#allocation4 + $0x1], 0 }
   0x2   :  { %11 = vsyncpa [#allocation7], 0 }
   0x3   :  { %12 = vsyncpa [#allocation5], 0 }
   0x4   :  { %14 = vsyncpa [#allocation5 + $0x1], 0  ;;  %s745_s12 = smov 0   ;;  %s747_s13 = smov 0  }
   0x5   :  { %s749_s14 = smov 0   ;;  %s751_s15 = smov 0  }
   0x6   :  { %s753_s16 = smov 0   ;;  %s755_s17 = smov 0  }
   0x7 LB: > { %s462_s18 = sadd.s32 4294967295, %s716_s17   ;;  %s463_s19 = sadd.s32 4294967294, %s716_s17   ;;  %s716_s17 = sphi %s755_s17, %s20_s17   ;;  %s712_s16 = sphi %s753_s16, %s995_s16   ;;  %s708_s15 = sphi %s751_s15, %s994_s15   ;;  %s704_s14 = sphi %s749_s14, %s993_s14   ;;  %s700_s13 = sphi %s747_s13, %s992_s13   ;;  %s696_s12 = sphi %s745_s12, %s991_s12  }
   0x8   : > { %p61_p0 = scmp.ne.s32.totalorder %s700_s13, %s696_s12  ;;  %p779_p1 = scmp.eq.s32.totalorder %s462_s18, 0 }
   0x9   : > { %p783_p2 = scmp.eq.s32.totalorder %s462_s18, 1  ;;  %p147_p3 = scmp.eq.s32.totalorder %s463_s19, 1 }
   0xa   : > { %s976_s20 = scalar_select %p779_p1, 1, 0 }
   0xb   : > { %s977_s21 = scalar_select %p783_p2, 1, 0 }
   0xc   : > { %p789_p4 = por %p779_p1, %p61_p0  ;;  %p464_p5 = scmp.ge.s32.totalorder %s716_s17, 1 }
   0xd   : > { %p794_p6 = por %p147_p3, %p61_p0  ;;  %p154_p7 = scmp.lt.s32.totalorder %s716_s17, 3 }
   0xe   : > { %s978_s22 = scalar_select %p789_p4, 1, 0 }
   0xf   : > { %s979_s23 = scalar_select %p794_p6, 1, 0 }
  0x10   : > { %p799_p8 = pnand %p464_p5, %p154_p7  ;;  %s718_s25 = smov [#allocation6]  }
  0x11   : > { %s170_s26 = sshll.u32 %s718_s25, 4  ;;  %s39_s28 = sadd.s32 1, %s712_s16  ;;  %s171_s26 = int_to_ptr.vmem [resolvable:$true] %s170_s26 }
  0x12   : > { %s980_s24 = scalar_select %p799_p8, 1, 0 }
  0x13   : > { %p501_p9 = pneg %p799_p8  ;;  %s572_s4 = scalar_lea.hbm %s969_s1, 256 }
  0x14   : > { %p573_p12 = scmp.ne.s32.totalorder %s969_s1, %s572_s4  ;;  %p579_p5 = scmp.lt.u32.totalorder %s572_s4, %s969_s1 }
  0x15   : > { %p808_p11 = pnand %p501_p9, %p779_p1 }
  0x17   : > { %p574_p13 = pneg %p808_p11 }
  0x19   : > { %p575_p0 = pnand %p574_p13, %p573_p12 }
  0x1b   : > { %p576_p3 = pneg %p575_p0 }
  0x1d   : > { %p581_p7 = pnand %p579_p5, %p576_p3 }
  0x1f   : > { %584 = shalt.err (!%p581_p7)
}
  0x20   : > { %s585_s9 = scalar_lea.vmem %s171_s26, 256  ;;  %p593_p1 = scmp.lt.s32.totalorder %s171_s26, %s171_s26 }
  0x21   : > { %p586_p9 = scmp.ne.s32.totalorder %s171_s26, %s585_s9  ;;  %p594_p4 = scmp.lt.s32.totalorder %s585_s9, %s585_s9 }
  0x23   : > { %p588_p10 = pnand %p586_p9, %p574_p13  ;;  %p595_p8 = por %p594_p4, %p593_p1 }
  0x25   : > { %p589_p6 = pneg %p588_p10 }
  0x27   : > { %p596_p2 = pnand %p595_p8, %p589_p6 }
  0x29   : > { %599 = shalt.err (!%p596_p2)
}
  0x2a   : > { %s719_s10 = smov 64   ;;  %s720_s11 = smov 4  }
  0x2b   : > { %504 = dma.hbm_to_vmem [thread:$0]  (!%p808_p11), %s969_s1, 256, %s171_s26, [#allocation7], %s719_s10, %s719_s10, %s720_s11  }
  0x2c   : > { %p41_p1 = scmp.ge.s32.totalorder %s39_s28, 2  ;;  %s48_s25 = sadd.s32 1, %s704_s14 }
  0x2d   : > { %p55_p2 = scmp.ne.s32.totalorder %s704_s14, %s700_s13  ;;  %p56_p4 = scmp.eq.s32.totalorder %s716_s17, 0 }
  0x2e   : > { %s997_s28 = smov (%p41_p1, %s39_s28), 0  ;;  %p983_p8 = scmp.ne.s32.totalorder %s977_s21, 0 }
  0x2f   : > { %p835_p6 = por %p56_p4, %p55_p2  ;;  %s43_s27 = ssub.s32 %s712_s16, %s997_s28 }
  0x30   : > { %p841_p10 = por %p983_p8, %p55_p2  ;;  %p514_p12 = scmp.lt.s32.totalorder %s716_s17, 2 }
  0x31   : > { %p46_p11 = scmp.eq.s32.totalorder %s43_s27, 0  ;;  %s190_s26 = sand.u32 1, %s704_s14  }
  0x32   : > { %s468_s4 = sshll.u32 %s190_s26, 2  ;;  %s469_s6 = sshll.u32 %s712_s16, 6 }
  0x33   : > { %s850_s5 = scalar_select %p46_p11, %s704_s14, %s48_s25  }
  0x34   : > { %s856_s9 = scalar_lea.hbm %s968_s0, %s469_s6  ;;  %s194_s21 = scalar_lea.vmem [#allocation3], %s468_s4 }
  0x35   : > { %s202_s10 = sshll.u32 %s194_s21, 4  ;;  %p862_p13 = pnand %p514_p12, %p835_p6  ;;  %s858_s10 = int_to_ptr.vmem [resolvable:$true] %s202_s10 }
  0x36   : > { %s191_s18 = scalar_lea.sflag [#allocation4], %s190_s26  ;;  %s600_s19 = scalar_lea.hbm %s856_s9, 64 }
  0x37   : > { %p601_p0 = scmp.ne.s32.totalorder %s856_s9, %s600_s19  ;;  %p602_p3 = pneg %p862_p13 }
  0x38   : > { %s605_s4 = scalar_lea.hbm %s968_s0, 128  ;;  %p606_p9 = scmp.lt.u32.totalorder %s856_s9, %s968_s0 }
  0x39   : > { %p603_p5 = pnand %p602_p3, %p601_p0  ;;  %p607_p1 = scmp.lt.u32.totalorder %s605_s4, %s600_s19 }
  0x3a   : > { %p609_p4 = scmp.lt.u32.totalorder %s600_s19, %s856_s9 }
  0x3b   : > { %p604_p7 = pneg %p603_p5  ;;  %p608_p2 = por %p607_p1, %p606_p9 }
  0x3d   : > { %p610_p6 = por %p609_p4, %p608_p2 }
  0x3f   : > { %p611_p8 = pnand %p610_p6, %p604_p7 }
  0x41   : > { %614 = shalt.err (!%p611_p8)
}
  0x42   : > { %s615_s26 = scalar_lea.vmem %s858_s10, 64  ;;  %s721_s7 = smov [#allocation3]  }
  0x43   : > { %p616_p12 = scmp.ne.s32.totalorder %s858_s10, %s615_s26  ;;  %s620_s8 = sshll.u32 %s721_s7, 4  ;;  %s621_s8 = int_to_ptr.vmem [resolvable:$false] %s620_s8 }
  0x44   : > { %s622_s21 = scalar_lea.vmem %s621_s8, 128  ;;  %p623_p5 = scmp.lt.s32.totalorder %s858_s10, %s621_s8 }
  0x45   : > { %p618_p11 = pnand %p616_p12, %p602_p3  ;;  %p624_p9 = scmp.lt.s32.totalorder %s622_s21, %s615_s26 }
  0x47   : > { %p619_p0 = pneg %p618_p11  ;;  %p625_p1 = por %p624_p9, %p623_p5 }
  0x49   : > { %p626_p2 = pnand %p625_p1, %p619_p0 }
  0x4b   : > { %629 = shalt.err (!%p626_p2)
}
  0x4c   : > { %508 = dma.hbm_to_vmem [thread:$0]  (!%p862_p13), %s856_s9, 64, %s858_s10, %s191_s18  }
  0x4d   : > { %p986_p7 = scmp.ne.s32.totalorder %s980_s24, 0 }
  0x4e   : > { %s894_s19 = sand.u32 (!%p986_p7), 1, %s700_s13   ;;  %p987_p3 = scmp.ne.s32.totalorder (!%p986_p7), %s978_s22, 0 }
  0x4f   : > { %211 = sbr.rel (%p986_p7) target bundleno = 339 (0x153), region = 32  ;;  %s471_s25 = sshll.u32 (!%p986_p7), %s894_s19, 2 }
  0x50   : > { %s214_s27 = scalar_lea.sflag (!%p986_p7), [#allocation4], %s894_s19  ;;  %s217_s4 = scalar_lea.vmem (!%p986_p7), [#allocation3], %s471_s25 }
  0x56   : > { %683 = dma.done.wait (%p987_p3), %s214_s27, 64  }
  0x57   : > { %685 = vsyncadd (%p987_p3), %s214_s27, 4294967232  ;;  %p988_p13 = scmp.ne.s32.totalorder %s976_s20, 0 }
  0x59   : > { %687 = dma.done.wait (%p988_p13), [#allocation7], 256  }
  0x5a   : > { %689 = vsyncadd (%p988_p13), [#allocation7], 4294967040  ;;  %vm256_vm0 = vcmask 785408   ;;  %v722_v0 = vmov 0.0   ;;  %vm723_vm1 = vmmov 0   ;;  %v570_v1 = vld [vmem:[#allocation6] sm:$0xff]  }
  0x5b   : > { %257 = vst.msk [vmem:[#allocation2] sm:$0xff] %vm256_vm0, %v722_v0  ;;  %485 = vmatprep.subr.bf16.mxu0 %v722_v0  ;;  %489 = vmatprep.mubr.msk.bf16.mxu0 %vm723_vm1, %v722_v0  ;;  %v571_v2 = vld [vmem:[#allocation6 + $0x8] sm:$0xff]   ;;  %v259_v3 = vld [vmem:[%s217_s4] sm:$0xf]  ;;  %vm276_vm2 = vcmask 261120   ;;  %s479_s24 = sshll.u32 %s708_s15, 6 }
  0x5c   : > { %486 = vmatpush3.bf16.msra.mxu0 %v570_v1  ;;  %v477_v10 = vld [vmem:[%s970_s2] ss:$0 sm:$0xff]  ;;  %s246_s9 = scalar_lea.vmem [#allocation8], %s471_s25  ;;  %vm336_vm3 = vcmask 781312   ;;  %s919_s29 = scalar_lea.hbm %s971_s3, %s479_s24 }
  0x5d   : > { %487 = vmatprep.subr.bf16.mxu0 %v722_v0  ;;  %s353_s10 = sshll.u32 %s246_s9, 4  ;;  %s339_s6 = scalar_lea.sflag [#allocation5], %s894_s19  ;;  %s921_s10 = int_to_ptr.vmem [resolvable:$true] %s353_s10 }
  0x5e   : > { %s630_s26 = scalar_lea.vmem %s921_s10, 64  ;;  %s724_s15 = smov [#allocation8]  }
  0x5f   : > { %p631_p4 = scmp.ne.s32.totalorder %s921_s10, %s630_s26  ;;  %s634_s7 = sshll.u32 %s724_s15, 4  ;;  %s635_s7 = int_to_ptr.vmem [resolvable:$false] %s634_s7 }
  0x60   : > { %488 = vmatpush3.bf16.msra.mxu0 %v571_v2  ;;  %s636_s8 = scalar_lea.vmem %s635_s7, 128  ;;  %p637_p12 = scmp.lt.s32.totalorder %s921_s10, %s635_s7 }
  0x61   : > { %p632_p6 = pnand %p631_p4, %p841_p10  ;;  %p638_p11 = scmp.lt.s32.totalorder %s636_s8, %s630_s26 }
  0x62   : > { %v258_v4 = vld [vmem:[#allocation2] sm:$0xff] }
  0x63   : > { %490 = vmatmul.mubr.msk.bf16.vlgmr.msra.gmra.mrb[0].mxu0 %vm276_vm2, %v259_v3  ;;  %p633_p8 = pneg %p632_p6  ;;  %p639_p0 = por %p638_p11, %p637_p12 }
  0x65   : > { %p640_p5 = pnand %p639_p0, %p633_p8 }
 0x136   : > { %v314_v5 = vpop.f32.mrb[0].mxu0 }
 0x137   : > { %v320_v6 = vadd.f32 %v314_v5, %v258_v4  ;;  %v491_v7 = vpop.f32.mrb[1].mxu0 }
 0x138   : > { %v317_v8 = vpop.f32.mrb[2].mxu0 }
 0x139   : > { %322 = vst.msk [vmem:[#allocation2] sm:$0xff] %vm256_vm0, %v320_v6  ;;  %v492_v9 = vpop.f32.mrb[3].mxu0 }
 0x140   : > { %v326_v11 = vld [vmem:[#allocation2] sm:$0xff] }
 0x141   : > { %v334_v12 = vadd.f32 %v477_v10, %v326_v11 }
 0x143   : > { %v335_v13 = vpack.c.bf16 %v334_v12, %v334_v12 }
 0x145   : > { %337 = vst.msk [vmem:[%s246_s9] sm:$0xf] %vm336_vm3, %v335_v13 }
 0x146   : > { %643 = shalt.err (!%p640_p5)
}
 0x147   : > { %s644_s21 = scalar_lea.hbm %s919_s29, 64  ;;  %s648_s27 = scalar_lea.hbm %s971_s3, 128 }
 0x148   : > { %p645_p9 = scmp.ne.s32.totalorder %s919_s29, %s644_s21  ;;  %p649_p7 = scmp.lt.u32.totalorder %s919_s29, %s971_s3 }
 0x149   : > { %p650_p3 = scmp.lt.u32.totalorder %s648_s27, %s644_s21  ;;  %p652_p4 = scmp.lt.u32.totalorder %s644_s21, %s919_s29 }
 0x14a   : > { %p646_p1 = pnand %p645_p9, %p841_p10 }
 0x14b   : > { %p651_p13 = por %p650_p3, %p649_p7 }
 0x14c   : > { %p647_p2 = pneg %p646_p1 }
 0x14d   : > { %p653_p6 = por %p652_p4, %p651_p13 }
 0x14f   : > { %p654_p8 = pnand %p653_p6, %p647_p2 }
 0x151   : > { %657 = shalt.err (!%p654_p8)
}
 0x152   : > { %499 = dma.vmem_to_hbm [thread:$0]  (%p841_p10), %s921_s10, 64, %s919_s29, %s339_s6  }
 0x153 PF: > { %s365_s22 = sand.u32 1, %s696_s12   ;;  %p989_p12 = scmp.ne.s32.totalorder %s979_s23, 0 }
 0x154   : > { %p990_p11 = scmp.ge.s32.totalorder %s716_s17, 2  ;;  %s366_s24 = scalar_lea.sflag [#allocation5], %s365_s22 }
 0x156   : > { %p510_p0 = pnand %p990_p11, %p989_p12 }
 0x158   : > { %691 = dma.done.wait (!%p510_p0), %s366_s24, 64  }
 0x159   : > { %693 = vsyncadd (!%p510_p0), %s366_s24, 4294967232  ;;  %s20_s17 = sadd.s32 1, %s716_s17   ;;  %s991_s12 = smov %s700_s13 }
 0x15a   : > { %p17_p5 = scmp.ge.s32.totalorder %s20_s17, 4   ;;  %s992_s13 = smov %s704_s14 }
 0x15b   : > { %s993_s14 = smov %s850_s5  ;;  %s994_s15 = smov %s712_s16 }
 0x15c   : > { %s995_s16 = smov %s997_s28  ;;  %19 = sbr.rel (!%p17_p5) target bundleno = 7 (0x7), region = 93 }
 0x163   :  { %371 = vsyncpa [#allocation4], 1 }
 0x164   :  { %373 = vsyncpa [#allocation4 + $0x1], 1 }
 0x165   :  { %374 = vsyncpa [#allocation7], 1 }
 0x166   :  { %375 = vsyncpa [#allocation5], 1 }
 0x167   :  { %377 = vsyncpa [#allocation5 + $0x1], 1 }

</bundles_post_ra>
